<compile_context>
chip_gen: v7x
topology: tpu7x:2x2x1
jax: 0.10.0
libtpu: 0.0.40
codegen_flags: <defaults>
</compile_context>

<pallas_src>
import jax
import jax.numpy as jnp
from jax import lax
from jax.experimental import pallas as pl
from jax.experimental.pallas import tpu as pltpu


def _round_up(n, m):
    return ((n + m - 1) // m) * m


def embedding_bag_softmax_kernel(x_ref, wt_ref, o_ref):
    # x_ref : (L, TB)  int32 indices, batch on lanes
    # wt_ref: (D, E)   f32 transposed embedding table (resident across the grid)
    # o_ref : (D, TB)  f32 softmax(mean-bag embedding), batch on lanes
    L, TB = x_ref.shape
    D, E = wt_ref.shape

    x = x_ref[...]                                               # (L, TB): one dense load
    e_ids = lax.broadcasted_iota(jnp.int32, (E, TB), 0)          # hoisted; reused every l

    # counts[e, b] = #{l : x[l, b] == e}  (lane-dense sublane-broadcast compares).
    counts = jnp.zeros((E, TB), jnp.int32)
    for l in range(L):                                           # static unroll; L is tiny
        counts = counts + (x[l:l + 1, :] == e_ids).astype(jnp.int32)
    counts_f = counts.astype(jnp.float32) * jnp.float32(1.0 / L)  # single convert + scale

    # EmbeddingBag(mode='mean') == W^T @ counts : one small MXU matmul, lane-dense result.
    emb = jnp.dot(wt_ref[...], counts_f, preferred_element_type=jnp.float32)   # (D, TB)

    # Numerically-stable softmax over the embedding dim (axis 0 here); exact division.
    m = jnp.max(emb, axis=0, keepdims=True)
    p = jnp.exp(emb - m)
    o_ref[...] = (p / jnp.sum(p, axis=0, keepdims=True)).astype(o_ref.dtype)


def sparse_gradient_forward(indices, emb_weight, *, row_tile=None):
    """Forward of SparseGradientModule.

    indices   : (B, L) integer bags     (PyTorch 2-D EmbeddingBag input)
    emb_weight: (E, D) float32 table    (PyTorch EmbeddingBag weight layout)
    returns   : (B, D) float32 softmax(mean-bag embedding)
    """
    B, L = indices.shape
    E, D = emb_weight.shape

    # Lane-major layouts for the kernel: batch on the 128-lane axis.  These transposes are
    # tiny XLA ops here; a producer/consumer already using (L, B)/(D, B) layouts (and
    # int8/int16 indices) could feed the pallas_call directly and skip them entirely.
    idx = jnp.asarray(indices, jnp.int32).T                      # (L, B)
    w_t = jnp.asarray(emb_weight, jnp.float32).T                 # (D, E) = (10, 10)

    # Batch tile along lanes.  Default 4096 keeps grid-step overhead negligible while
    # using < 1 MiB of double-buffered VMEM per step (safe on every TPU generation).
    bp128 = _round_up(B, 128)
    if row_tile is not None:
        TB = max(128, min(_round_up(row_tile, 128), bp128))
    else:
        TB = min(4096, bp128)
        # Keep >= 2 grid steps when the batch allows it (v7x has 2 TensorCores/chip and
        # the "parallel" row grid is how this kernel uses both).
        if bp128 >= 256 and bp128 // TB < 2:
            TB = _round_up((bp128 + 1) // 2, 128)
    Bp = _round_up(B, TB)
    if Bp != B:
        idx = jnp.pad(idx, ((0, 0), (0, Bp - B)))                # padded cols sliced off below

    out = pl.pallas_call(
        embedding_bag_softmax_kernel,
        out_shape=jax.ShapeDtypeStruct((D, Bp), jnp.float32),
        grid=(Bp // TB,),
        in_specs=[
            pl.BlockSpec((L, TB), lambda i: (0, i)),             # index tile: batch on lanes
            pl.BlockSpec((D, E), lambda i: (0, 0)),              # table: VMEM-resident
        ],
        out_specs=pl.BlockSpec((D, TB), lambda i: (0, i)),
        compiler_params=pltpu.CompilerParams(dimension_semantics=("parallel",)),
        cost_estimate=pl.CostEstimate(
            flops=Bp * (2 * E * D + L * E + 4 * D),
            transcendentals=Bp * D,
            bytes_accessed=4 * (Bp * L + E * D + Bp * D),
        ),
    )(idx, w_t)

    return out[:, :B].T                                          # back to (B, D)


if __name__ == "__main__":
    key = jax.random.PRNGKey(0)
    k_idx, k_w = jax.random.split(key)

    B, L = 8, 8      # 8 bags, 8 indices per bag
    E, D = 10, 10    # nn.EmbeddingBag(10, 10)

    indices = jax.random.randint(k_idx, (B, L), 0, E, dtype=jnp.int32)
    weight = jax.random.normal(k_w, (E, D), dtype=jnp.float32)   # EmbeddingBag init ~ N(0, 1)

    out = jax.block_until_ready(sparse_gradient_forward(indices, weight))

    # pure-JAX reference: mean-mode embedding bag + softmax(dim=1)
    ref = jax.nn.softmax(jnp.mean(weight[indices], axis=1), axis=1)

    assert out.shape == (B, D)
    assert jnp.allclose(out, ref, atol=5e-3, rtol=5e-3), float(jnp.max(jnp.abs(out - ref)))
    assert jnp.allclose(jnp.sum(out, axis=1), 1.0, atol=1e-4)

    # TODO(synk): sparse=True only changes the backward (sparse-gradient) path, which a
    # forward-only Pallas kernel does not model.
    print("KERNEL_OK")
</pallas_src>

<mosaic_0001>
module attributes {stable_mosaic.version = 11 : i64} {
  func.func @embedding_bag_softmax_kernel(%arg0: i32, %arg1: memref<8x128xi32, #tpu.memory_space<vmem>>, %arg2: memref<10x10xf32, #tpu.memory_space<vmem>>, %arg3: memref<10x128xf32, #tpu.memory_space<vmem>>) attributes {dimension_semantics = [#tpu.dimension_semantics<parallel>], iteration_bounds = array<i64: 1>, scalar_prefetch = 0 : i64, scratch_operands = 0 : i64, tpu.core_type = #tpu.core_type<tc>, window_params = [{transform_indices = @transform_0, window_bounds = array<i64: 8, 128>}, {pipeline_mode = #tpu.pipeline_mode<synchronous>, transform_indices = @transform_1, window_bounds = array<i64: 10, 10>}, {transform_indices = @transform_2, window_bounds = array<i64: 10, 128>}]} {
    %c0 = arith.constant 0 : index
    %c0_0 = arith.constant 0 : index
    %0 = vector.load %arg1[%c0, %c0_0] : memref<8x128xi32, #tpu.memory_space<vmem>>, vector<8x128xi32>
    %1 = tpu.iota {dimensions = array<i32: 0>} : vector<10x128xi32>
    %c0_i32 = arith.constant 0 : i32
    %2 = vector.broadcast %c0_i32 : i32 to vector<10x128xi32>
    %3 = vector.extract_strided_slice %0 {offsets = [0, 0], sizes = [1, 128], strides = [1, 1]} : vector<8x128xi32> to vector<1x128xi32>
    %4 = vector.broadcast %3 : vector<1x128xi32> to vector<10x128xi32>
    %5 = arith.cmpi eq, %4, %1 : vector<10x128xi32>
    %6 = arith.extui %5 : vector<10x128xi1> to vector<10x128xi32>
    %7 = arith.addi %2, %6 : vector<10x128xi32>
    %8 = vector.extract_strided_slice %0 {offsets = [1, 0], sizes = [1, 128], strides = [1, 1]} : vector<8x128xi32> to vector<1x128xi32>
    %9 = vector.broadcast %8 : vector<1x128xi32> to vector<10x128xi32>
    %10 = arith.cmpi eq, %9, %1 : vector<10x128xi32>
    %11 = arith.extui %10 : vector<10x128xi1> to vector<10x128xi32>
    %12 = arith.addi %7, %11 : vector<10x128xi32>
    %13 = vector.extract_strided_slice %0 {offsets = [2, 0], sizes = [1, 128], strides = [1, 1]} : vector<8x128xi32> to vector<1x128xi32>
    %14 = vector.broadcast %13 : vector<1x128xi32> to vector<10x128xi32>
    %15 = arith.cmpi eq, %14, %1 : vector<10x128xi32>
    %16 = arith.extui %15 : vector<10x128xi1> to vector<10x128xi32>
    %17 = arith.addi %12, %16 : vector<10x128xi32>
    %18 = vector.extract_strided_slice %0 {offsets = [3, 0], sizes = [1, 128], strides = [1, 1]} : vector<8x128xi32> to vector<1x128xi32>
    %19 = vector.broadcast %18 : vector<1x128xi32> to vector<10x128xi32>
    %20 = arith.cmpi eq, %19, %1 : vector<10x128xi32>
    %21 = arith.extui %20 : vector<10x128xi1> to vector<10x128xi32>
    %22 = arith.addi %17, %21 : vector<10x128xi32>
    %23 = vector.extract_strided_slice %0 {offsets = [4, 0], sizes = [1, 128], strides = [1, 1]} : vector<8x128xi32> to vector<1x128xi32>
    %24 = vector.broadcast %23 : vector<1x128xi32> to vector<10x128xi32>
    %25 = arith.cmpi eq, %24, %1 : vector<10x128xi32>
    %26 = arith.extui %25 : vector<10x128xi1> to vector<10x128xi32>
    %27 = arith.addi %22, %26 : vector<10x128xi32>
    %28 = vector.extract_strided_slice %0 {offsets = [5, 0], sizes = [1, 128], strides = [1, 1]} : vector<8x128xi32> to vector<1x128xi32>
    %29 = vector.broadcast %28 : vector<1x128xi32> to vector<10x128xi32>
    %30 = arith.cmpi eq, %29, %1 : vector<10x128xi32>
    %31 = arith.extui %30 : vector<10x128xi1> to vector<10x128xi32>
    %32 = arith.addi %27, %31 : vector<10x128xi32>
    %33 = vector.extract_strided_slice %0 {offsets = [6, 0], sizes = [1, 128], strides = [1, 1]} : vector<8x128xi32> to vector<1x128xi32>
    %34 = vector.broadcast %33 : vector<1x128xi32> to vector<10x128xi32>
    %35 = arith.cmpi eq, %34, %1 : vector<10x128xi32>
    %36 = arith.extui %35 : vector<10x128xi1> to vector<10x128xi32>
    %37 = arith.addi %32, %36 : vector<10x128xi32>
    %38 = vector.extract_strided_slice %0 {offsets = [7, 0], sizes = [1, 128], strides = [1, 1]} : vector<8x128xi32> to vector<1x128xi32>
    %39 = vector.broadcast %38 : vector<1x128xi32> to vector<10x128xi32>
    %40 = arith.cmpi eq, %39, %1 : vector<10x128xi32>
    %41 = arith.extui %40 : vector<10x128xi1> to vector<10x128xi32>
    %42 = arith.addi %37, %41 : vector<10x128xi32>
    %43 = arith.sitofp %42 : vector<10x128xi32> to vector<10x128xf32>
    %cst = arith.constant 1.250000e-01 : f32
    %44 = vector.broadcast %cst : f32 to vector<10x128xf32>
    %45 = arith.mulf %43, %44 : vector<10x128xf32>
    %c0_1 = arith.constant 0 : index
    %c0_2 = arith.constant 0 : index
    %46 = vector.load %arg2[%c0_1, %c0_2] : memref<10x10xf32, #tpu.memory_space<vmem>>, vector<10x10xf32>
    %cst_3 = arith.constant dense<0.000000e+00> : vector<10x128xf32>
    %47 = tpu.matmul %46, %45, %cst_3 {dimension_numbers = #tpu.dot_dimension_numbers<[1], [0], [0], [1], [0, 0, 1, 1], [], []>} : vector<10x10xf32>, vector<10x128xf32>, vector<10x128xf32> -> vector<10x128xf32>
    %cst_4 = arith.constant dense<0xFF800000> : vector<128xf32>
    %48 = vector.multi_reduction <maximumf>, %47, %cst_4 [0] : vector<10x128xf32> to vector<128xf32>
    %49 = vector.shape_cast %48 : vector<128xf32> to vector<1x128xf32>
    %50 = vector.broadcast %49 : vector<1x128xf32> to vector<10x128xf32>
    %51 = arith.subf %47, %50 : vector<10x128xf32>
    %52 = math.exp %51 : vector<10x128xf32>
    %cst_5 = arith.constant dense<0.000000e+00> : vector<128xf32>
    %53 = vector.multi_reduction <add>, %52, %cst_5 [0] : vector<10x128xf32> to vector<128xf32>
    %54 = vector.shape_cast %53 : vector<128xf32> to vector<1x128xf32>
    %55 = vector.broadcast %54 : vector<1x128xf32> to vector<10x128xf32>
    %56 = arith.divf %52, %55 : vector<10x128xf32>
    %c0_6 = arith.constant 0 : index
    %c0_7 = arith.constant 0 : index
    %57 = vector.load %arg3[%c0_6, %c0_7] : memref<10x128xf32, #tpu.memory_space<vmem>>, vector<10x128xf32>
    tpu.vector_store %arg3[%c0_6, %c0_7], %56 {strides = array<i32>} : memref<10x128xf32, #tpu.memory_space<vmem>>, vector<10x128xf32>,
    return
  }
  func.func @transform_0(%arg0: i32) -> (i32, i32) {
    %c0_i32 = arith.constant 0 : i32
    %c0_i32_0 = arith.constant 0 : i32
    return %c0_i32, %arg0 : i32, i32
  }
  func.func @transform_1(%arg0: i32) -> (i32, i32) {
    %c0_i32 = arith.constant 0 : i32
    %c0_i32_0 = arith.constant 0 : i32
    %c0_i32_1 = arith.constant 0 : i32
    return %c0_i32, %c0_i32_0 : i32, i32
  }
  func.func @transform_2(%arg0: i32) -> (i32, i32) {
    %c0_i32 = arith.constant 0 : i32
    %c0_i32_0 = arith.constant 0 : i32
    return %c0_i32, %arg0 : i32, i32
  }
}

</mosaic_0001>

<bundles_post_ra>
// kernel: tpu_custom_call.1
= control target key start
LH: loop header
LB: loop body
LE: loop exit
PB: predicated region body
PF: predicated region fallthrough
CT: control target
= control target key end

     0   :  { %7 = vsyncpa [#allocation3], 0  ;;  %s457_s0 = inlined_call_operand.hbm [shape: s32[8,128], index: 0, kind: input, shape index: {}]   ;;  %s458_s1 = inlined_call_operand.hbm [shape: f32[10,10], index: 1, kind: input, shape index: {}]   ;;  %s459_s2 = inlined_call_operand.hbm [shape: f32[10,128], index: 2, kind: output, shape index: {}]  }
   0x1   :  { %8 = vsyncpa [#allocation6], 0 }
   0x2   :  { %9 = vsyncpa [#allocation4], 0  ;;  %s362_s9 = smov [#allocation2]   ;;  %s363_s11 = smov [#allocation5]  }
   0x3   :  { %s16_s10 = sshll.u32 %s362_s9, 4  ;;  %s25_s12 = sshll.u32 %s363_s11, 4  ;;  %s17_s10 = int_to_ptr.vmem [resolvable:$true] %s16_s10  ;;  %s384_s12 = int_to_ptr.vmem [resolvable:$true] %s25_s12 }
   0x4   :  { %s290_s15 = scalar_lea.hbm %s457_s0, 128 }
   0x5   :  { %p291_p0 = scmp.ne.s32.totalorder %s457_s0, %s290_s15  ;;  %p294_p1 = scmp.lt.u32.totalorder %s290_s15, %s457_s0 }
   0x7   :  { %p296_p2 = pnand %p294_p1, %p291_p0 }
   0x9   :  { %299 = shalt.err (!%p296_p2)
}
   0xa   :  { %s300_s20 = scalar_lea.vmem %s17_s10, 128  ;;  %p305_p4 = scmp.lt.s32.totalorder %s17_s10, %s17_s10 }
   0xb   :  { %p301_p3 = scmp.ne.s32.totalorder %s17_s10, %s300_s20  ;;  %p306_p5 = scmp.lt.s32.totalorder %s300_s20, %s300_s20 }
   0xd   :  { %p307_p6 = por %p306_p5, %p305_p4 }
   0xf   :  { %p308_p7 = pnand %p307_p6, %p301_p3 }
  0x11   :  { %311 = shalt.err (!%p308_p7)
}
  0x12   :  { %19 = dma.hbm_to_vmem [thread:$0]  %s457_s0, 128, %s17_s10, [#allocation3]  }
  0x13   :  { %s312_s25 = scalar_lea.hbm %s458_s1, 256 }
  0x14   :  { %p313_p8 = scmp.ne.s32.totalorder %s458_s1, %s312_s25  ;;  %p316_p9 = scmp.lt.u32.totalorder %s312_s25, %s458_s1 }
  0x16   :  { %p318_p10 = pnand %p316_p9, %p313_p8 }
  0x18   :  { %321 = shalt.err (!%p318_p10)
}
  0x19   :  { %s322_s30 = scalar_lea.vmem %s384_s12, 256  ;;  %p327_p12 = scmp.lt.s32.totalorder %s384_s12, %s384_s12 }
  0x1a   :  { %p323_p11 = scmp.ne.s32.totalorder %s384_s12, %s322_s30  ;;  %p328_p13 = scmp.lt.s32.totalorder %s322_s30, %s322_s30 }
  0x1c   :  { %p329_p0 = por %p328_p13, %p327_p12 }
  0x1e   :  { %p330_p1 = pnand %p329_p0, %p323_p11 }
  0x20   :  { %333 = shalt.err (!%p330_p1)
}
  0x21   :  { %s364_s0 = smov 128   ;;  %s365_s3 = smov 8  }
  0x22   :  { %31 = dma.hbm_to_vmem [thread:$0]  %s458_s1, 256, %s384_s12, [#allocation6], %s364_s0, %s364_s0, %s365_s3  }
  0x23   :  { %356 = dma.done.wait [#allocation3], 128  }
  0x24   :  { %357 = vsyncadd [#allocation3], 4294967168 }
  0x25   :  { %358 = dma.done.wait [#allocation6], 256  }
  0x26   :  { %359 = vsyncadd [#allocation6], 4294967040  ;;  %v39_v0 = vlaneseq  ;;  %vm126_vm0 = vcmask 80896   ;;  %v38_v11 = vld [vmem:[#allocation2] sm:$0xff]  ;;  %v124_v12 = vld [vmem:[#allocation5] sm:$0xff]  ;;  %v366_v21 = vmov 0  }
  0x27   :  { %268 = vmatprep.mubr.msk.f32.mxu0 %vm126_vm0, %v124_v12  ;;  %v125_v57 = vld [vmem:[#allocation5 + $0x8] sm:$0x3]  ;;  %s368_s1 = smov [#allocation7]  }
  0x28   :  { %v418_v1 = vshrl.u32 %v39_v0, 7  ;;  %s244_s6 = sshll.u32 %s368_s1, 4  ;;  %s245_s6 = int_to_ptr.vmem [resolvable:$true] %s244_s6 }
  0x29   :  { %s334_s7 = scalar_lea.vmem %s245_s6, 256  ;;  %p339_p3 = scmp.lt.s32.totalorder %s245_s6, %s245_s6 }
  0x2a   :  { %v44_v2 = vsub.s32 0, %v418_v1  ;;  %v52_v3 = vsub.s32 1, %v418_v1  ;;  %v62_v4 = vsub.s32 2, %v418_v1  ;;  %v72_v5 = vsub.s32 3, %v418_v1  ;;  %p335_p2 = scmp.ne.s32.totalorder %s245_s6, %s334_s7  ;;  %p340_p4 = scmp.lt.s32.totalorder %s334_s7, %s334_s7 }
  0x2b   :  { %v82_v6 = vsub.s32 4, %v418_v1  ;;  %v92_v7 = vsub.s32 5, %v418_v1  ;;  %v102_v8 = vsub.s32 6, %v418_v1  ;;  %v41_v9 = vadd.s32 8, %v418_v1 }
  0x2c   :  { %v112_v10 = vsub.s32 7, %v418_v1  ;;  %v45_v13 = vrot.slane %v38_v11, %v44_v2  ;;  %v53_v14 = vrot.slane %v38_v11, %v52_v3  ;;  %v63_v15 = vrot.slane %v38_v11, %v62_v4  ;;  %p341_p5 = por %p340_p4, %p339_p3 }
  0x2d   :  { %v73_v16 = vrot.slane %v38_v11, %v72_v5  ;;  %v83_v17 = vrot.slane %v38_v11, %v82_v6  ;;  %v93_v18 = vrot.slane %v38_v11, %v92_v7  ;;  %v103_v19 = vrot.slane %v38_v11, %v102_v8 }
  0x2e   :  { %v113_v20 = vrot.slane %v38_v11, %v112_v10  ;;  %vm46_vm1 = vcmp.eq.s32.totalorder %v45_v13, %v418_v1  ;;  %vm47_vm2 = vcmp.eq.s32.totalorder %v45_v13, %v41_v9  ;;  %vm54_vm3 = vcmp.eq.s32.totalorder %v53_v14, %v418_v1  ;;  %p342_p6 = pnand %p341_p5, %p335_p2 }
  0x2f   :  { %vm55_vm4 = vcmp.eq.s32.totalorder %v53_v14, %v41_v9  ;;  %v48_v22 = vsel %vm46_vm1, 1, %v366_v21  ;;  %v49_v23 = vsel %vm47_vm2, 1, %v366_v21  ;;  %v56_v24 = vsel %vm54_vm3, 1, %v366_v21 }
  0x30   :  { %v57_v25 = vsel %vm55_vm4, 1, %v366_v21  ;;  %v58_v26 = vadd.s32 %v56_v24, %v48_v22  ;;  %vm64_vm5 = vcmp.eq.s32.totalorder %v63_v15, %v418_v1  ;;  %vm65_vm6 = vcmp.eq.s32.totalorder %v63_v15, %v41_v9 }
  0x31   :  { %v59_v27 = vadd.s32 %v57_v25, %v49_v23  ;;  %v66_v28 = vsel %vm64_vm5, 1, %v366_v21  ;;  %v67_v29 = vsel %vm65_vm6, 1, %v366_v21  ;;  %vm74_vm7 = vcmp.eq.s32.totalorder %v73_v16, %v418_v1 }
  0x32   :  { %vm75_vm8 = vcmp.eq.s32.totalorder %v73_v16, %v41_v9  ;;  %v68_v30 = vadd.s32 %v66_v28, %v58_v26  ;;  %v76_v32 = vsel %vm74_vm7, 1, %v366_v21  ;;  %vm84_vm9 = vcmp.eq.s32.totalorder %v83_v17, %v418_v1 }
  0x33   :  { %v69_v31 = vadd.s32 %v67_v29, %v59_v27  ;;  %v77_v33 = vsel %vm75_vm8, 1, %v366_v21  ;;  %vm85_vm10 = vcmp.eq.s32.totalorder %v83_v17, %v41_v9  ;;  %vm94_vm11 = vcmp.eq.s32.totalorder %v93_v18, %v418_v1 }
  0x34   :  { %vm95_vm12 = vcmp.eq.s32.totalorder %v93_v18, %v41_v9  ;;  %v78_v34 = vadd.s32 %v76_v32, %v68_v30  ;;  %v86_v36 = vsel %vm84_vm9, 1, %v366_v21  ;;  %v87_v37 = vsel %vm85_vm10, 1, %v366_v21 }
  0x35   :  { %v79_v35 = vadd.s32 %v77_v33, %v69_v31  ;;  %v96_v38 = vsel %vm94_vm11, 1, %v366_v21  ;;  %v97_v39 = vsel %vm95_vm12, 1, %v366_v21  ;;  %vm104_vm13 = vcmp.eq.s32.totalorder %v103_v19, %v418_v1 }
  0x36   :  { %vm105_vm14 = vcmp.eq.s32.totalorder %v103_v19, %v41_v9  ;;  %v88_v40 = vadd.s32 %v86_v36, %v78_v34  ;;  %v106_v42 = vsel %vm104_vm13, 1, %v366_v21  ;;  %vm114_vm15 = vcmp.eq.s32.totalorder %v113_v20, %v418_v1 }
  0x37   :  { %v89_v41 = vadd.s32 %v87_v37, %v79_v35  ;;  %v107_v43 = vsel %vm105_vm14, 1, %v366_v21  ;;  %vm115_vm1 = vcmp.eq.s32.totalorder %v113_v20, %v41_v9  ;;  %v116_v46 = vsel %vm114_vm15, 1, %v366_v21 }
  0x38   :  { %v98_v44 = vadd.s32 %v96_v38, %v88_v40  ;;  %v117_v47 = vsel %vm115_vm1, 1, %v366_v21  ;;  %vm133_vm2 = vcmask 1041408   ;;  %vm367_vm3 = vmmov 1  }
  0x39   :  { %v99_v45 = vadd.s32 %v97_v39, %v89_v41  ;;  %vm272_vm4 = vmpackc.low %vm133_vm2, %vm367_vm3 }
  0x3a   :  { %v108_v48 = vadd.s32 %v106_v42, %v98_v44 }
  0x3b   :  { %v109_v49 = vadd.s32 %v107_v43, %v99_v45 }
  0x3c   :  { %v118_v50 = vadd.s32 %v116_v46, %v108_v48 }
  0x3d   :  { %v119_v51 = vadd.s32 %v117_v47, %v109_v49 }
  0x3e   :  { %v120_v52 = vcvt.s32.f32 %v118_v50 }
  0x3f   :  { %v121_v53 = vcvt.s32.f32 %v119_v51 }
  0x40   :  { %v122_v54 = vmul.f32 0.125, %v120_v52 }
  0x41   :  { %v123_v55 = vmul.f32 0.125, %v121_v53 }
  0x43   :  { %v271_v56 = vpack.c.bf16 %v123_v55, %v122_v54 }
  0x45   :  { %273 = vmatprep.subr.msk.bf16.mxu0 %vm272_vm4, %v271_v56 }
  0x46   :  { %276 = vmatpush3.bf16.msk.msra.mxu0 %vm272_vm4, %v271_v56 }
  0x49   :  { %269 = vmatmul.mubr.msk.f32.vlgmr.msra.gmra.mrb[0].mxu0 %vm126_vm0, %v125_v57 }
 0x11c   :  { %v270_v58 = vpop.f32.mrb[0].mxu0 }
 0x11d   :  { %v203_v59 = vpop.f32.mrb[1].mxu0  ;;  %v212_v60 = vsel %vm133_vm2, %v270_v58, -inf }
 0x11e   :  { %v213_v61 = vmax.f32 %v203_v59, %v212_v60 }
 0x120   :  { %v214_v62 = vrot.slane %v213_v61, 4 }
 0x122   :  { %v215_v63 = vmax.f32 %v213_v61, %v214_v62 }
 0x124   :  { %v216_v0 = vrot.slane %v215_v63, 2 }
 0x126   :  { %v217_v1 = vmax.f32 %v215_v63, %v216_v0 }
 0x128   :  { %v218_v2 = vrot.slane %v217_v1, 1 }
 0x12a   :  { %v219_v3 = vmax.f32 %v217_v1, %v218_v2 }
 0x12c   :  { %v220_v4 = vsub.f32 %v203_v59, %v219_v3  ;;  %v221_v5 = vsub.f32 %v270_v58, %v219_v3 }
 0x12e   :  { %v222_v6 = vmul.f32 1.442695, %v220_v4  ;;  %v224_v7 = vmul.f32 1.442695, %v221_v5 }
 0x130   :  { %284 = vpow2.f32 %v222_v6 }
 0x131   :  { %286 = vpow2.f32 %v224_v7 }
 0x13a   :  { %v285_v8 = vpop.eup %284 }
 0x13b   :  { %v287_v9 = vpop.eup %286 }
 0x13c   :  { %v226_v10 = vsel %vm133_vm2, %v287_v9, 0.0 }
 0x13d   :  { %v227_v11 = vadd.f32 %v285_v8, %v226_v10 }
 0x13f   :  { %v228_v12 = vrot.slane %v227_v11, 4 }
 0x141   :  { %v229_v13 = vadd.f32 %v228_v12, %v227_v11 }
 0x143   :  { %v230_v14 = vrot.slane %v229_v13, 2 }
 0x145   :  { %v231_v15 = vadd.f32 %v230_v14, %v229_v13 }
 0x147   :  { %v232_v16 = vrot.slane %v231_v15, 1 }
 0x149   :  { %v233_v17 = vadd.f32 %v232_v16, %v231_v15 }
 0x14b   :  { %288 = vrcp.f32 %v233_v17 }
 0x155   :  { %v289_v18 = vpop.eup %288 }
 0x156   :  { %v235_v19 = vmul.f32 %v289_v18, %v285_v8  ;;  %v236_v20 = vmul.f32 %v289_v18, %v287_v9 }
 0x158   :  { %237 = vst [vmem:[#allocation7] sm:$0xff] %v235_v19  ;;  %238 = vst [vmem:[#allocation7 + $0x8] sm:$0x3] %v236_v20 }
 0x159   :  { %345 = shalt.err (!%p342_p6)
}
 0x15a   :  { %s346_s10 = scalar_lea.hbm %s459_s2, 256 }
 0x15b   :  { %p347_p7 = scmp.ne.s32.totalorder %s459_s2, %s346_s10  ;;  %p350_p8 = scmp.lt.u32.totalorder %s346_s10, %s459_s2 }
 0x15d   :  { %p352_p9 = pnand %p350_p8, %p347_p7 }
 0x15f   :  { %355 = shalt.err (!%p352_p9)
}
 0x160   :  { %250 = dma.vmem_to_hbm [thread:$0]  %s245_s6, 256, %s459_s2, [#allocation4], %s364_s0, %s364_s0, %s365_s3  }
 0x161   :  { %360 = dma.done.wait [#allocation4], 256  }
 0x162   :  { %361 = vsyncadd [#allocation4], 4294967040 }
 0x163   :  { %254 = vsyncpa [#allocation3], 1 }
 0x164   :  { %255 = vsyncpa [#allocation6], 1 }
 0x165   :  { %256 = vsyncpa [#allocation4], 1 }

</bundles_post_ra>
